<compile_context>
chip_gen: v7x
topology: tpu7x:2x2x1
jax: 0.10.0
libtpu: 0.0.40
codegen_flags: <defaults>
</compile_context>

<pallas_src>
import functools

import jax
import jax.numpy as jnp
from jax import lax
from jax.experimental import pallas as pl
from jax.experimental.pallas import tpu as pltpu


def _conv_tile(x_ref, w_ref, *, C_in, C_out, K, L_out, stride):
    """Conv1d on one (already zero-padded) batch tile via VPU broadcast-FMAs.

    x_ref: (NB, C_in, L_pad) VMEM block.
    w_ref: (C_out, C_in*K) VMEM block, w_ref[co, ci*K + k] = weight[co, ci, k].
    Returns y: (NB, C_out, L_out) float32, L_out on the 128-lane axis.
    """
    NB = x_ref.shape[0]
    wv = w_ref[...].astype(jnp.float32)                      # tiny, load once
    y = jnp.zeros((NB, C_out, L_out), jnp.float32)
    # TODO(synk): for large C_in*K (>=128) route this contraction to the MXU
    # (blocked jnp.dot over an im2col'd VMEM tile) and tile L_out with halos.
    for ci in range(C_in):
        for k in range(K):
            # (1, C_out, 1): C_out stays on the sublane axis -> no relayout.
            wtap = wv[:, ci * K + k:ci * K + k + 1][None, :, :]
            if stride == 1:
                xs = x_ref[:, ci, pl.ds(k, L_out)]            # (NB, L_out)
            else:
                # TODO(synk): strided lane loads are slow; use a reshape-based
                # subsample if stride > 1 ever becomes a hot path.
                xs = x_ref[:, ci, pl.ds(k, L_out, stride)]
            y = y + wtap * xs.astype(jnp.float32)[:, None, :]
    return y


def _fused_kernel(activation, eps, conv_args, x_ref, w_ref, g_ref, b_ref, out_ref):
    """Single-tile path: conv -> batch stats -> fused BN affine (+ReLU) -> store."""
    y = _conv_tile(x_ref, w_ref, **conv_args)                 # (N, C_out, L_out)
    cnt = y.shape[0] * y.shape[2]
    s1 = jnp.sum(jnp.sum(y, axis=0, keepdims=True), axis=2, keepdims=True)
    s2 = jnp.sum(jnp.sum(y * y, axis=0, keepdims=True), axis=2, keepdims=True)
    mean = s1 / cnt                                           # (1, C_out, 1)
    var = jnp.maximum(s2 / cnt - mean * mean, 0.0)            # biased variance
    a = g_ref[...][None] * lax.rsqrt(var + eps)               # (1, C_out, 1)
    b = b_ref[...][None] - mean * a
    out = y * a + b
    if activation:
        out = jnp.maximum(out, 0.0)
    out_ref[...] = out.astype(out_ref.dtype)


def _stats_kernel(N, NB, conv_args, x_ref, w_ref, sums_ref):
    """Pass 1: accumulate per-channel sum and sum-of-squares of the conv output."""
    @pl.when(pl.program_id(0) == 0)
    def _():
        sums_ref[...] = jnp.zeros_like(sums_ref)

    y = _conv_tile(x_ref, w_ref, **conv_args)                 # (NB, C_out, L_out)
    if N % NB != 0:                                           # mask padded batch rows
        rows = pl.program_id(0) * NB + lax.broadcasted_iota(jnp.int32, y.shape, 0)
        y = jnp.where(rows < N, y, 0.0)
    sums_ref[0:1, :] += jnp.sum(jnp.sum(y, axis=0, keepdims=True), axis=2)
    sums_ref[1:2, :] += jnp.sum(jnp.sum(y * y, axis=0, keepdims=True), axis=2)


def _normalize_kernel(activation, conv_args, x_ref, w_ref, a_ref, b_ref, out_ref):
    """Pass 2: recompute conv tile, apply fused BN affine (+ ReLU), store lane-dense."""
    y = _conv_tile(x_ref, w_ref, **conv_args)                 # (NB, C_out, L_out)
    out = y * a_ref[...][None] + b_ref[...][None]             # (1, C_out, 1) bcast
    if activation:
        out = jnp.maximum(out, 0.0)
    out_ref[...] = out.astype(out_ref.dtype)


def basic_conv(x, weight, gamma, beta, *, stride, padding, activation,
               eps=1e-5, batch_tile=None):
    """Forward pass of BasicConv.  x: (N, C_in, L) -> (N, C_out, L_out)."""
    N, C_in, L = x.shape
    C_out, _, K = weight.shape
    L_pad = L + 2 * padding
    L_out = (L_pad - K) // stride + 1

    # Glue: zero-pad along L only (single cheap pass; no K-fold im2col inflation).
    x_pad = x.astype(jnp.float32)
    if padding:
        x_pad = jnp.pad(x_pad, ((0, 0), (0, 0), (padding, padding)))
    # (C_out, C_in, K) -> (C_out, C_in*K): one column per (ci, k) tap.
    w2 = weight.astype(jnp.float32).reshape(C_out, C_in * K)
    g2 = gamma.astype(jnp.float32).reshape(C_out, 1)
    b2 = beta.astype(jnp.float32).reshape(C_out, 1)

    # Batch-tile size: keep each block a few MiB so double-buffering fits the
    # default scoped VMEM limits on every generation (v5e 16 MiB ... v7x 32 MiB).
    row_bytes = 4 * (C_in * L_pad + 2 * C_out * L_out)
    NB = max(1, min(N, (4 * 1024 * 1024) // max(row_bytes, 1)))
    if batch_tile is not None:
        NB = max(1, min(NB, batch_tile))
    n_tiles = pl.cdiv(N, NB)
    conv_args = dict(C_in=C_in, C_out=C_out, K=K, L_out=L_out, stride=stride)

    x_spec = pl.BlockSpec((NB, C_in, L_pad), lambda i: (i, 0, 0))
    w_spec = pl.BlockSpec((C_out, C_in * K), lambda i: (0, 0))
    v_spec = pl.BlockSpec((C_out, 1), lambda i: (0, 0))
    out_spec = pl.BlockSpec((NB, C_out, L_out), lambda i: (i, 0, 0))

    if n_tiles == 1:
        # Whole batch fits in one VMEM tile: fully fused single pass over x.
        return pl.pallas_call(
            functools.partial(_fused_kernel, activation, eps, conv_args),
            out_shape=jax.ShapeDtypeStruct((N, C_out, L_out), x.dtype),
            grid=(1,),
            in_specs=[x_spec, w_spec, v_spec, v_spec],
            out_specs=out_spec,
            compiler_params=pltpu.CompilerParams(dimension_semantics=("arbitrary",)),
        )(x_pad, w2, g2, b2)

    # ---- pass 1: per-channel sum / sum-of-squares over all (N, L_out) ----
    sums = pl.pallas_call(
        functools.partial(_stats_kernel, N, NB, conv_args),
        out_shape=jax.ShapeDtypeStruct((2, C_out), jnp.float32),
        grid=(n_tiles,),
        in_specs=[x_spec, w_spec],
        out_specs=pl.BlockSpec((2, C_out), lambda i: (0, 0)),
        compiler_params=pltpu.CompilerParams(dimension_semantics=("arbitrary",)),
    )(x_pad, w2)

    # Fused BN affine on tiny (C_out,) vectors: out = y*a + b.
    count = float(N * L_out)
    mean = sums[0] / count
    var = jnp.maximum(sums[1] / count - mean * mean, 0.0)     # biased variance
    a = gamma.astype(jnp.float32) * lax.rsqrt(var + eps)
    b = beta.astype(jnp.float32) - mean * a

    # ---- pass 2: recompute conv tiles, normalize, ReLU, store (N, C_out, L_out) ----
    return pl.pallas_call(
        functools.partial(_normalize_kernel, activation, conv_args),
        out_shape=jax.ShapeDtypeStruct((N, C_out, L_out), x.dtype),
        grid=(n_tiles,),
        in_specs=[x_spec, w_spec, v_spec, v_spec],
        out_specs=out_spec,
        compiler_params=pltpu.CompilerParams(dimension_semantics=("parallel",)),
    )(x_pad, w2, a.reshape(C_out, 1), b.reshape(C_out, 1))


def _reference(x, weight, gamma, beta, *, stride, padding, activation, eps=1e-5):
    y = jax.lax.conv_general_dilated(
        x, weight, window_strides=(stride,), padding=[(padding, padding)],
        dimension_numbers=("NCH", "OIH", "NCH"))
    mean = jnp.mean(y, axis=(0, 2), keepdims=True)
    var = jnp.mean(jnp.square(y - mean), axis=(0, 2), keepdims=True)
    out = (y - mean) * jax.lax.rsqrt(var + eps) * gamma[None, :, None] + beta[None, :, None]
    if activation:
        out = jnp.maximum(out, 0.0)
    return out


if __name__ == "__main__":
    # TODO(synk): BatchNorm1d running-stat buffer updates (training-side state)
    # are not part of the functional forward implemented here.
    key = jax.random.PRNGKey(0)
    kx, kw, kg, kb, kx2 = jax.random.split(key, 5)

    # BasicConv(in_channel=4, out_channel=8, kernel_size=3, stride=1, padding=1,
    #           bias=False, activation=True)
    C_in, C_out, K = 4, 8, 3
    stride, padding = 1, 1
    weight = 0.1 * jax.random.normal(kw, (C_out, C_in, K), dtype=jnp.float32)  # Conv1d weight
    gamma = 1.0 + 0.1 * jax.random.normal(kg, (C_out,), dtype=jnp.float32)     # BN weight
    beta = 0.1 * jax.random.normal(kb, (C_out,), dtype=jnp.float32)            # BN bias

    # Config A: small batch -> fully fused single-pass kernel path.
    x_a = jax.random.normal(kx, (2, C_in, 16), dtype=jnp.float32)
    out_a = jax.block_until_ready(
        basic_conv(x_a, weight, gamma, beta,
                   stride=stride, padding=padding, activation=True))
    ref_a = _reference(x_a, weight, gamma, beta,
                       stride=stride, padding=padding, activation=True)
    if not jnp.allclose(out_a, ref_a, atol=1e-4, rtol=1e-4):
        raise AssertionError("fused-path Pallas output does not match JAX reference")

    # Config B: forced batch tiling -> two-pass (stats + normalize) path.
    x_b = jax.random.normal(kx2, (4, C_in, 16), dtype=jnp.float32)
    out_b = jax.block_until_ready(
        basic_conv(x_b, weight, gamma, beta,
                   stride=stride, padding=padding, activation=False, batch_tile=2))
    ref_b = _reference(x_b, weight, gamma, beta,
                       stride=stride, padding=padding, activation=False)
    if not jnp.allclose(out_b, ref_b, atol=1e-4, rtol=1e-4):
        raise AssertionError("two-pass Pallas output does not match JAX reference")

    print("KERNEL_OK")
</pallas_src>

<mosaic_0001>
module attributes {stable_mosaic.version = 11 : i64} {
  func.func @_fused_kernel(%arg0: i32, %arg1: memref<2x4x18xf32, #tpu.memory_space<vmem>>, %arg2: memref<8x12xf32, #tpu.memory_space<vmem>>, %arg3: memref<8x1xf32, #tpu.memory_space<vmem>>, %arg4: memref<8x1xf32, #tpu.memory_space<vmem>>, %arg5: memref<2x8x16xf32, #tpu.memory_space<vmem>>) attributes {dimension_semantics = [#tpu.dimension_semantics<arbitrary>], iteration_bounds = array<i64: 1>, scalar_prefetch = 0 : i64, scratch_operands = 0 : i64, tpu.core_type = #tpu.core_type<tc>, window_params = [{transform_indices = @transform_0, window_bounds = array<i64: 2, 4, 18>}, {pipeline_mode = #tpu.pipeline_mode<synchronous>, transform_indices = @transform_1, window_bounds = array<i64: 8, 12>}, {pipeline_mode = #tpu.pipeline_mode<synchronous>, transform_indices = @transform_2, window_bounds = array<i64: 8, 1>}, {pipeline_mode = #tpu.pipeline_mode<synchronous>, transform_indices = @transform_3, window_bounds = array<i64: 8, 1>}, {transform_indices = @transform_4, window_bounds = array<i64: 2, 8, 16>}]} {
    %c0 = arith.constant 0 : index
    %c0_0 = arith.constant 0 : index
    %0 = vector.load %arg2[%c0, %c0_0] : memref<8x12xf32, #tpu.memory_space<vmem>>, vector<8x12xf32>
    %cst = arith.constant 0.000000e+00 : f32
    %1 = vector.broadcast %cst : f32 to vector<2x8x16xf32>
    %2 = vector.extract_strided_slice %0 {offsets = [0, 0], sizes = [8, 1], strides = [1, 1]} : vector<8x12xf32> to vector<8x1xf32>
    %3 = vector.shape_cast %2 : vector<8x1xf32> to vector<1x8x1xf32>
    %c0_1 = arith.constant 0 : index
    %c0_2 = arith.constant 0 : index
    %c0_3 = arith.constant 0 : index
    %4 = vector.load %arg1[%c0_1, %c0_2, %c0_3] : memref<2x4x18xf32, #tpu.memory_space<vmem>>, vector<2x1x16xf32>
    %5 = vector.shape_cast %4 : vector<2x1x16xf32> to vector<2x16xf32>
    %6 = vector.shape_cast %5 : vector<2x16xf32> to vector<2x1x16xf32>
    %7 = vector.broadcast %3 : vector<1x8x1xf32> to vector<2x8x16xf32>
    %8 = vector.broadcast %6 : vector<2x1x16xf32> to vector<2x8x16xf32>
    %9 = arith.mulf %7, %8 : vector<2x8x16xf32>
    %10 = arith.addf %1, %9 : vector<2x8x16xf32>
    %11 = vector.extract_strided_slice %0 {offsets = [0, 1], sizes = [8, 1], strides = [1, 1]} : vector<8x12xf32> to vector<8x1xf32>
    %12 = vector.shape_cast %11 : vector<8x1xf32> to vector<1x8x1xf32>
    %c0_4 = arith.constant 0 : index
    %c0_5 = arith.constant 0 : index
    %c1 = arith.constant 1 : index
    %13 = vector.load %arg1[%c0_4, %c0_5, %c1] : memref<2x4x18xf32, #tpu.memory_space<vmem>>, vector<2x1x16xf32>
    %14 = vector.shape_cast %13 : vector<2x1x16xf32> to vector<2x16xf32>
    %15 = vector.shape_cast %14 : vector<2x16xf32> to vector<2x1x16xf32>
    %16 = vector.broadcast %12 : vector<1x8x1xf32> to vector<2x8x16xf32>
    %17 = vector.broadcast %15 : vector<2x1x16xf32> to vector<2x8x16xf32>
    %18 = arith.mulf %16, %17 : vector<2x8x16xf32>
    %19 = arith.addf %10, %18 : vector<2x8x16xf32>
    %20 = vector.extract_strided_slice %0 {offsets = [0, 2], sizes = [8, 1], strides = [1, 1]} : vector<8x12xf32> to vector<8x1xf32>
    %21 = vector.shape_cast %20 : vector<8x1xf32> to vector<1x8x1xf32>
    %c0_6 = arith.constant 0 : index
    %c0_7 = arith.constant 0 : index
    %c2 = arith.constant 2 : index
    %22 = vector.load %arg1[%c0_6, %c0_7, %c2] : memref<2x4x18xf32, #tpu.memory_space<vmem>>, vector<2x1x16xf32>
    %23 = vector.shape_cast %22 : vector<2x1x16xf32> to vector<2x16xf32>
    %24 = vector.shape_cast %23 : vector<2x16xf32> to vector<2x1x16xf32>
    %25 = vector.broadcast %21 : vector<1x8x1xf32> to vector<2x8x16xf32>
    %26 = vector.broadcast %24 : vector<2x1x16xf32> to vector<2x8x16xf32>
    %27 = arith.mulf %25, %26 : vector<2x8x16xf32>
    %28 = arith.addf %19, %27 : vector<2x8x16xf32>
    %29 = vector.extract_strided_slice %0 {offsets = [0, 3], sizes = [8, 1], strides = [1, 1]} : vector<8x12xf32> to vector<8x1xf32>
    %30 = vector.shape_cast %29 : vector<8x1xf32> to vector<1x8x1xf32>
    %c0_8 = arith.constant 0 : index
    %c1_9 = arith.constant 1 : index
    %c0_10 = arith.constant 0 : index
    %31 = vector.load %arg1[%c0_8, %c1_9, %c0_10] : memref<2x4x18xf32, #tpu.memory_space<vmem>>, vector<2x1x16xf32>
    %32 = vector.shape_cast %31 : vector<2x1x16xf32> to vector<2x16xf32>
    %33 = vector.shape_cast %32 : vector<2x16xf32> to vector<2x1x16xf32>
    %34 = vector.broadcast %30 : vector<1x8x1xf32> to vector<2x8x16xf32>
    %35 = vector.broadcast %33 : vector<2x1x16xf32> to vector<2x8x16xf32>
    %36 = arith.mulf %34, %35 : vector<2x8x16xf32>
    %37 = arith.addf %28, %36 : vector<2x8x16xf32>
    %38 = vector.extract_strided_slice %0 {offsets = [0, 4], sizes = [8, 1], strides = [1, 1]} : vector<8x12xf32> to vector<8x1xf32>
    %39 = vector.shape_cast %38 : vector<8x1xf32> to vector<1x8x1xf32>
    %c0_11 = arith.constant 0 : index
    %c1_12 = arith.constant 1 : index
    %c1_13 = arith.constant 1 : index
    %40 = vector.load %arg1[%c0_11, %c1_12, %c1_13] : memref<2x4x18xf32, #tpu.memory_space<vmem>>, vector<2x1x16xf32>
    %41 = vector.shape_cast %40 : vector<2x1x16xf32> to vector<2x16xf32>
    %42 = vector.shape_cast %41 : vector<2x16xf32> to vector<2x1x16xf32>
    %43 = vector.broadcast %39 : vector<1x8x1xf32> to vector<2x8x16xf32>
    %44 = vector.broadcast %42 : vector<2x1x16xf32> to vector<2x8x16xf32>
    %45 = arith.mulf %43, %44 : vector<2x8x16xf32>
    %46 = arith.addf %37, %45 : vector<2x8x16xf32>
    %47 = vector.extract_strided_slice %0 {offsets = [0, 5], sizes = [8, 1], strides = [1, 1]} : vector<8x12xf32> to vector<8x1xf32>
    %48 = vector.shape_cast %47 : vector<8x1xf32> to vector<1x8x1xf32>
    %c0_14 = arith.constant 0 : index
    %c1_15 = arith.constant 1 : index
    %c2_16 = arith.constant 2 : index
    %49 = vector.load %arg1[%c0_14, %c1_15, %c2_16] : memref<2x4x18xf32, #tpu.memory_space<vmem>>, vector<2x1x16xf32>
    %50 = vector.shape_cast %49 : vector<2x1x16xf32> to vector<2x16xf32>
    %51 = vector.shape_cast %50 : vector<2x16xf32> to vector<2x1x16xf32>
    %52 = vector.broadcast %48 : vector<1x8x1xf32> to vector<2x8x16xf32>
    %53 = vector.broadcast %51 : vector<2x1x16xf32> to vector<2x8x16xf32>
    %54 = arith.mulf %52, %53 : vector<2x8x16xf32>
    %55 = arith.addf %46, %54 : vector<2x8x16xf32>
    %56 = vector.extract_strided_slice %0 {offsets = [0, 6], sizes = [8, 1], strides = [1, 1]} : vector<8x12xf32> to vector<8x1xf32>
    %57 = vector.shape_cast %56 : vector<8x1xf32> to vector<1x8x1xf32>
    %c0_17 = arith.constant 0 : index
    %c2_18 = arith.constant 2 : index
    %c0_19 = arith.constant 0 : index
    %58 = vector.load %arg1[%c0_17, %c2_18, %c0_19] : memref<2x4x18xf32, #tpu.memory_space<vmem>>, vector<2x1x16xf32>
    %59 = vector.shape_cast %58 : vector<2x1x16xf32> to vector<2x16xf32>
    %60 = vector.shape_cast %59 : vector<2x16xf32> to vector<2x1x16xf32>
    %61 = vector.broadcast %57 : vector<1x8x1xf32> to vector<2x8x16xf32>
    %62 = vector.broadcast %60 : vector<2x1x16xf32> to vector<2x8x16xf32>
    %63 = arith.mulf %61, %62 : vector<2x8x16xf32>
    %64 = arith.addf %55, %63 : vector<2x8x16xf32>
    %65 = vector.extract_strided_slice %0 {offsets = [0, 7], sizes = [8, 1], strides = [1, 1]} : vector<8x12xf32> to vector<8x1xf32>
    %66 = vector.shape_cast %65 : vector<8x1xf32> to vector<1x8x1xf32>
    %c0_20 = arith.constant 0 : index
    %c2_21 = arith.constant 2 : index
    %c1_22 = arith.constant 1 : index
    %67 = vector.load %arg1[%c0_20, %c2_21, %c1_22] : memref<2x4x18xf32, #tpu.memory_space<vmem>>, vector<2x1x16xf32>
    %68 = vector.shape_cast %67 : vector<2x1x16xf32> to vector<2x16xf32>
    %69 = vector.shape_cast %68 : vector<2x16xf32> to vector<2x1x16xf32>
    %70 = vector.broadcast %66 : vector<1x8x1xf32> to vector<2x8x16xf32>
    %71 = vector.broadcast %69 : vector<2x1x16xf32> to vector<2x8x16xf32>
    %72 = arith.mulf %70, %71 : vector<2x8x16xf32>
    %73 = arith.addf %64, %72 : vector<2x8x16xf32>
    %74 = vector.extract_strided_slice %0 {offsets = [0, 8], sizes = [8, 1], strides = [1, 1]} : vector<8x12xf32> to vector<8x1xf32>
    %75 = vector.shape_cast %74 : vector<8x1xf32> to vector<1x8x1xf32>
    %c0_23 = arith.constant 0 : index
    %c2_24 = arith.constant 2 : index
    %c2_25 = arith.constant 2 : index
    %76 = vector.load %arg1[%c0_23, %c2_24, %c2_25] : memref<2x4x18xf32, #tpu.memory_space<vmem>>, vector<2x1x16xf32>
    %77 = vector.shape_cast %76 : vector<2x1x16xf32> to vector<2x16xf32>
    %78 = vector.shape_cast %77 : vector<2x16xf32> to vector<2x1x16xf32>
    %79 = vector.broadcast %75 : vector<1x8x1xf32> to vector<2x8x16xf32>
    %80 = vector.broadcast %78 : vector<2x1x16xf32> to vector<2x8x16xf32>
    %81 = arith.mulf %79, %80 : vector<2x8x16xf32>
    %82 = arith.addf %73, %81 : vector<2x8x16xf32>
    %83 = vector.extract_strided_slice %0 {offsets = [0, 9], sizes = [8, 1], strides = [1, 1]} : vector<8x12xf32> to vector<8x1xf32>
    %84 = vector.shape_cast %83 : vector<8x1xf32> to vector<1x8x1xf32>
    %c0_26 = arith.constant 0 : index
    %c3 = arith.constant 3 : index
    %c0_27 = arith.constant 0 : index
    %85 = vector.load %arg1[%c0_26, %c3, %c0_27] : memref<2x4x18xf32, #tpu.memory_space<vmem>>, vector<2x1x16xf32>
    %86 = vector.shape_cast %85 : vector<2x1x16xf32> to vector<2x16xf32>
    %87 = vector.shape_cast %86 : vector<2x16xf32> to vector<2x1x16xf32>
    %88 = vector.broadcast %84 : vector<1x8x1xf32> to vector<2x8x16xf32>
    %89 = vector.broadcast %87 : vector<2x1x16xf32> to vector<2x8x16xf32>
    %90 = arith.mulf %88, %89 : vector<2x8x16xf32>
    %91 = arith.addf %82, %90 : vector<2x8x16xf32>
    %92 = vector.extract_strided_slice %0 {offsets = [0, 10], sizes = [8, 1], strides = [1, 1]} : vector<8x12xf32> to vector<8x1xf32>
    %93 = vector.shape_cast %92 : vector<8x1xf32> to vector<1x8x1xf32>
    %c0_28 = arith.constant 0 : index
    %c3_29 = arith.constant 3 : index
    %c1_30 = arith.constant 1 : index
    %94 = vector.load %arg1[%c0_28, %c3_29, %c1_30] : memref<2x4x18xf32, #tpu.memory_space<vmem>>, vector<2x1x16xf32>
    %95 = vector.shape_cast %94 : vector<2x1x16xf32> to vector<2x16xf32>
    %96 = vector.shape_cast %95 : vector<2x16xf32> to vector<2x1x16xf32>
    %97 = vector.broadcast %93 : vector<1x8x1xf32> to vector<2x8x16xf32>
    %98 = vector.broadcast %96 : vector<2x1x16xf32> to vector<2x8x16xf32>
    %99 = arith.mulf %97, %98 : vector<2x8x16xf32>
    %100 = arith.addf %91, %99 : vector<2x8x16xf32>
    %101 = vector.extract_strided_slice %0 {offsets = [0, 11], sizes = [8, 1], strides = [1, 1]} : vector<8x12xf32> to vector<8x1xf32>
    %102 = vector.shape_cast %101 : vector<8x1xf32> to vector<1x8x1xf32>
    %c0_31 = arith.constant 0 : index
    %c3_32 = arith.constant 3 : index
    %c2_33 = arith.constant 2 : index
    %103 = vector.load %arg1[%c0_31, %c3_32, %c2_33] : memref<2x4x18xf32, #tpu.memory_space<vmem>>, vector<2x1x16xf32>
    %104 = vector.shape_cast %103 : vector<2x1x16xf32> to vector<2x16xf32>
    %105 = vector.shape_cast %104 : vector<2x16xf32> to vector<2x1x16xf32>
    %106 = vector.broadcast %102 : vector<1x8x1xf32> to vector<2x8x16xf32>
    %107 = vector.broadcast %105 : vector<2x1x16xf32> to vector<2x8x16xf32>
    %108 = arith.mulf %106, %107 : vector<2x8x16xf32>
    %109 = arith.addf %100, %108 : vector<2x8x16xf32>
    %cst_34 = arith.constant dense<0.000000e+00> : vector<8x16xf32>
    %110 = vector.multi_reduction <add>, %109, %cst_34 [0] : vector<2x8x16xf32> to vector<8x16xf32>
    %111 = vector.shape_cast %110 : vector<8x16xf32> to vector<1x8x16xf32>
    %cst_35 = arith.constant dense<0.000000e+00> : vector<1x8xf32>
    %112 = vector.multi_reduction <add>, %111, %cst_35 [2] : vector<1x8x16xf32> to vector<1x8xf32>
    %113 = vector.shape_cast %112 : vector<1x8xf32> to vector<1x8x1xf32>
    %114 = arith.mulf %109, %109 : vector<2x8x16xf32>
    %cst_36 = arith.constant dense<0.000000e+00> : vector<8x16xf32>
    %115 = vector.multi_reduction <add>, %114, %cst_36 [0] : vector<2x8x16xf32> to vector<8x16xf32>
    %116 = vector.shape_cast %115 : vector<8x16xf32> to vector<1x8x16xf32>
    %cst_37 = arith.constant dense<0.000000e+00> : vector<1x8xf32>
    %117 = vector.multi_reduction <add>, %116, %cst_37 [2] : vector<1x8x16xf32> to vector<1x8xf32>
    %118 = vector.shape_cast %117 : vector<1x8xf32> to vector<1x8x1xf32>
    %cst_38 = arith.constant 3.200000e+01 : f32
    %119 = vector.broadcast %cst_38 : f32 to vector<1x8x1xf32>
    %120 = arith.divf %113, %119 : vector<1x8x1xf32>
    %cst_39 = arith.constant 3.200000e+01 : f32
    %121 = vector.broadcast %cst_39 : f32 to vector<1x8x1xf32>
    %122 = arith.divf %118, %121 : vector<1x8x1xf32>
    %123 = arith.mulf %120, %120 : vector<1x8x1xf32>
    %124 = arith.subf %122, %123 : vector<1x8x1xf32>
    %cst_40 = arith.constant 0.000000e+00 : f32
    %125 = vector.broadcast %cst_40 : f32 to vector<1x8x1xf32>
    %126 = arith.maximumf %124, %125 : vector<1x8x1xf32>
    %c0_41 = arith.constant 0 : index
    %c0_42 = arith.constant 0 : index
    %127 = vector.load %arg3[%c0_41, %c0_42] : memref<8x1xf32, #tpu.memory_space<vmem>>, vector<8x1xf32>
    %128 = vector.shape_cast %127 : vector<8x1xf32> to vector<1x8x1xf32>
    %cst_43 = arith.constant 9.99999974E-6 : f32
    %129 = vector.broadcast %cst_43 : f32 to vector<1x8x1xf32>
    %130 = arith.addf %126, %129 : vector<1x8x1xf32>
    %131 = math.rsqrt %130 : vector<1x8x1xf32>
    %132 = arith.mulf %128, %131 : vector<1x8x1xf32>
    %c0_44 = arith.constant 0 : index
    %c0_45 = arith.constant 0 : index
    %133 = vector.load %arg4[%c0_44, %c0_45] : memref<8x1xf32, #tpu.memory_space<vmem>>, vector<8x1xf32>
    %134 = vector.shape_cast %133 : vector<8x1xf32> to vector<1x8x1xf32>
    %135 = arith.mulf %120, %132 : vector<1x8x1xf32>
    %136 = arith.subf %134, %135 : vector<1x8x1xf32>
    %137 = vector.broadcast %132 : vector<1x8x1xf32> to vector<2x8x16xf32>
    %138 = arith.mulf %109, %137 : vector<2x8x16xf32>
    %139 = vector.broadcast %136 : vector<1x8x1xf32> to vector<2x8x16xf32>
    %140 = arith.addf %138, %139 : vector<2x8x16xf32>
    %cst_46 = arith.constant 0.000000e+00 : f32
    %141 = vector.broadcast %cst_46 : f32 to vector<2x8x16xf32>
    %142 = arith.maximumf %140, %141 : vector<2x8x16xf32>
    %c0_47 = arith.constant 0 : index
    %c0_48 = arith.constant 0 : index
    %c0_49 = arith.constant 0 : index
    %143 = vector.load %arg5[%c0_47, %c0_48, %c0_49] : memref<2x8x16xf32, #tpu.memory_space<vmem>>, vector<2x8x16xf32>
    tpu.vector_store %arg5[%c0_47, %c0_48, %c0_49], %142 {strides = array<i32>} : memref<2x8x16xf32, #tpu.memory_space<vmem>>, vector<2x8x16xf32>,
    return
  }
  func.func @transform_0(%arg0: i32) -> (i32, i32, i32) {
    %c0_i32 = arith.constant 0 : i32
    %c0_i32_0 = arith.constant 0 : i32
    %c0_i32_1 = arith.constant 0 : i32
    return %arg0, %c0_i32, %c0_i32_0 : i32, i32, i32
  }
  func.func @transform_1(%arg0: i32) -> (i32, i32) {
    %c0_i32 = arith.constant 0 : i32
    %c0_i32_0 = arith.constant 0 : i32
    %c0_i32_1 = arith.constant 0 : i32
    return %c0_i32, %c0_i32_0 : i32, i32
  }
  func.func @transform_2(%arg0: i32) -> (i32, i32) {
    %c0_i32 = arith.constant 0 : i32
    %c0_i32_0 = arith.constant 0 : i32
    %c0_i32_1 = arith.constant 0 : i32
    return %c0_i32, %c0_i32_0 : i32, i32
  }
  func.func @transform_3(%arg0: i32) -> (i32, i32) {
    %c0_i32 = arith.constant 0 : i32
    %c0_i32_0 = arith.constant 0 : i32
    %c0_i32_1 = arith.constant 0 : i32
    return %c0_i32, %c0_i32_0 : i32, i32
  }
  func.func @transform_4(%arg0: i32) -> (i32, i32, i32) {
    %c0_i32 = arith.constant 0 : i32
    %c0_i32_0 = arith.constant 0 : i32
    %c0_i32_1 = arith.constant 0 : i32
    return %arg0, %c0_i32, %c0_i32_0 : i32, i32, i32
  }
}

</mosaic_0001>

<bundles_post_ra>
// kernel: tpu_custom_call.1
= control target key start
LH: loop header
LB: loop body
LE: loop exit
PB: predicated region body
PF: predicated region fallthrough
CT: control target
= control target key end

     0   :  { %v347_v1 = vmov 1   ;;  %v348_v2 = vmov 4   ;;  %s458_s0 = inlined_call_operand.vmem [shape: f32[2,4,18], index: 0, kind: input, shape index: {}]   ;;  %s459_s1 = inlined_call_operand.vmem [shape: f32[8,12], index: 1, kind: input, shape index: {}]   ;;  %s460_s2 = inlined_call_operand.vmem [shape: f32[8,1], index: 2, kind: input, shape index: {}]   ;;  %s461_s3 = inlined_call_operand.vmem [shape: f32[8,1], index: 3, kind: input, shape index: {}]   ;;  %s462_s4 = inlined_call_operand.hbm [shape: f32[2,8,16], index: 4, kind: output, shape index: {}]  }
   0x1   :  { %v18_v0 = vld [vmem:[%s459_s1] sm:$0xff]  ;;  %307 = vset.pattern.permute.xlu0 %v347_v1  ;;  %309 = vset.pattern.permute.xlu1 %v348_v2 }
   0x2   :  { %39 = vperm.xlu0 %307, %v18_v0   ;;  %89 = vperm.xlu1 %309, %v18_v0  }
   0x3   :  { %9 = vsyncpa [#allocation3], 0  ;;  %v349_v3 = vmov 2   ;;  %v350_v4 = vmov 5   ;;  %v351_v5 = vmov 7   ;;  %v352_v6 = vmov 8  }
   0x4   :  { %v353_v7 = vmov 10   ;;  %v354_v8 = vmov 0   ;;  %v355_v9 = vmov 11   ;;  %v356_v10 = vmov 9   ;;  %v282_v13 = vld [vmem:[%s458_s0] ss:$0 sm:$0xff] }
   0x5   :  { %v357_v11 = vmov 3   ;;  %v358_v12 = vmov 6   ;;  %v283_v14 = vld [vmem:[%s458_s0 + $0x4] ss:$0 sm:$0xff]  ;;  %s359_s20 = smov 127   ;;  %s360_s25 = smov 126  }
   0x6   :  { %308 = vset.pattern.permute.xlu0 %v349_v3  ;;  %310 = vset.pattern.permute.xlu1 %v350_v4  ;;  %v284_v19 = vld [vmem:[%s458_s0 + $0x1] ss:$0 sm:$0xff]  ;;  %v285_v20 = vld [vmem:[%s458_s0 + $0x5] ss:$0 sm:$0xff]  ;;  %v286_v27 = vld [vmem:[%s458_s0 + $0x2] ss:$0 sm:$0xff] }
   0x7   :  { %55 = vperm.xlu0 %308, %v18_v0   ;;  %105 = vperm.xlu1 %310, %v18_v0   ;;  %v287_v34 = vld [vmem:[%s458_s0 + $0x6] ss:$0 sm:$0xff]  ;;  %v288_v35 = vld [vmem:[%s458_s0 + $0x3] ss:$0 sm:$0xff]  ;;  %v289_v42 = vld [vmem:[%s458_s0 + $0x7] ss:$0 sm:$0xff] }
   0x8   :  { %vm220_vm0 = vcmask 130048   ;;  %s361_s11 = smov [#allocation2]  }
   0x9   :  { %s271_s12 = sshll.u32 %s361_s11, 4  ;;  %s272_s12 = int_to_ptr.vmem [resolvable:$true] %s271_s12 }
   0xa   :  { %p328_p1 = scmp.lt.s32.totalorder %s272_s12, %s272_s12 }
   0xb   :  { %311 = vset.pattern.permute.xlu1 %v351_v5  ;;  %312 = vset.pattern.permute.xlu0 %v352_v6 }
   0xc   :  { %139 = vperm.xlu1 %311, %v18_v0   ;;  %155 = vperm.xlu0 %312, %v18_v0  }
  0x10   :  { %313 = vset.pattern.permute.xlu1 %v353_v7  ;;  %315 = vset.pattern.permute.xlu0 %v354_v8 }
  0x11   :  { %189 = vperm.xlu1 %313, %v18_v0   ;;  %23 = vperm.xlu0 %315, %v18_v0  }
  0x15   :  { %314 = vset.pattern.permute.xlu1 %v355_v9  ;;  %318 = vset.pattern.permute.xlu0 %v356_v10 }
  0x16   :  { %205 = vperm.xlu1 %314, %v18_v0   ;;  %173 = vperm.xlu0 %318, %v18_v0  }
  0x1a   :  { %316 = vset.pattern.permute.xlu1 %v357_v11  ;;  %319 = vset.pattern.permute.xlu0 %v354_v8 }
  0x1b   :  { %73 = vperm.xlu1 %316, %v18_v0  }
  0x1f   :  { %317 = vset.pattern.permute.xlu1 %v358_v12 }
  0x20   :  { %123 = vperm.xlu1 %317, %v18_v0  }
  0x24   :  { %320 = vset.pattern.permute.xlu1 %v354_v8 }
  0x81   :  { %v40_v15 = vpop.permute.xlu0 %39  ;;  %v90_v16 = vpop.permute.xlu1 %89 }
  0x82   :  { %v42_v17 = vmul.f32 %v282_v13, %v40_v15  ;;  %v43_v18 = vmul.f32 %v283_v14, %v40_v15  ;;  %v92_v25 = vmul.f32 %v284_v19, %v90_v16  ;;  %v93_v26 = vmul.f32 %v285_v20, %v90_v16 }
  0x84   :  { %48 = vrot.lane.b32.xlu0 %v43_v18, %s359_s20  ;;  %46 = vrot.lane.b32.xlu1 %v42_v17, %s359_s20 }
  0x86   :  { %v56_v21 = vpop.permute.xlu0 %55  ;;  %v106_v22 = vpop.permute.xlu1 %105 }
  0x87   :  { %v58_v23 = vmul.f32 %v282_v13, %v56_v21  ;;  %v59_v24 = vmul.f32 %v283_v14, %v56_v21  ;;  %v108_v29 = vmul.f32 %v284_v19, %v106_v22  ;;  %v109_v36 = vmul.f32 %v285_v20, %v106_v22 }
  0x89   :  { %64 = vrot.lane.b32.xlu1 %v59_v24, %s360_s25  ;;  %62 = vrot.lane.b32.xlu0 %v58_v23, %s360_s25 }
  0x8b   :  { %v140_v28 = vpop.permute.xlu1 %139  ;;  %v156_v31 = vpop.permute.xlu0 %155 }
  0x8c   :  { %v142_v30 = vmul.f32 %v286_v27, %v140_v28  ;;  %v158_v33 = vmul.f32 %v286_v27, %v156_v31  ;;  %v143_v37 = vmul.f32 %v287_v34, %v140_v28  ;;  %v159_v40 = vmul.f32 %v287_v34, %v156_v31 }
  0x8d   :  { %98 = vrot.lane.b32.xlu1 %v93_v26, %s359_s20  ;;  %96 = vrot.lane.b32.xlu0 %v92_v25, %s359_s20 }
  0x90   :  { %v190_v32 = vpop.permute.xlu1 %189  ;;  %v24_v46 = vpop.permute.xlu0 %23 }
  0x91   :  { %112 = vrot.lane.b32.xlu1 %v108_v29, %s360_s25  ;;  %146 = vrot.lane.b32.xlu0 %v142_v30, %s359_s20  ;;  %v192_v38 = vmul.f32 %v288_v35, %v190_v32  ;;  %v193_v43 = vmul.f32 %v289_v42, %v190_v32  ;;  %v34_v49 = vmul.f32 %v282_v13, %v24_v46 }
  0x92   :  { %v35_v50 = vmul.f32 %v283_v14, %v24_v46 }
  0x95   :  { %114 = vrot.lane.b32.xlu1 %v109_v36, %s360_s25  ;;  %162 = vrot.lane.b32.xlu0 %v158_v33, %s360_s25  ;;  %v206_v39 = vpop.permute.xlu1 %205  ;;  %v174_v48 = vpop.permute.xlu0 %173 }
  0x96   :  { %v208_v41 = vmul.f32 %v288_v35, %v206_v39  ;;  %v209_v44 = vmul.f32 %v289_v42, %v206_v39  ;;  %v184_v13 = vmul.f32 %v288_v35, %v174_v48  ;;  %v185_v21 = vmul.f32 %v289_v42, %v174_v48 }
  0x99   :  { %148 = vrot.lane.b32.xlu1 %v143_v37, %s359_s20  ;;  %196 = vrot.lane.b32.xlu0 %v192_v38, %s359_s20 }
  0x9a   :  { %v74_v45 = vpop.permute.xlu1 %73 }
  0x9b   :  { %v84_v57 = vmul.f32 %v284_v19, %v74_v45  ;;  %v85_v58 = vmul.f32 %v285_v20, %v74_v45 }
  0x9d   :  { %164 = vrot.lane.b32.xlu1 %v159_v40, %s360_s25  ;;  %212 = vrot.lane.b32.xlu0 %v208_v41, %s360_s25 }
  0x9f   :  { %v124_v47 = vpop.permute.xlu1 %123 }
  0xa0   :  { %v134_v4 = vmul.f32 %v286_v27, %v124_v47  ;;  %v135_v10 = vmul.f32 %v287_v34, %v124_v47 }
  0xa1   :  { %198 = vrot.lane.b32.xlu1 %v193_v43, %s359_s20 }
  0xa5   :  { %214 = vrot.lane.b32.xlu1 %v209_v44, %s360_s25 }
  0xf6   :  { %v47_v51 = vpop.permute.xlu1 %46  ;;  %v49_v52 = vpop.permute.xlu0 %48 }
  0xf7   :  { %v52_v53 = vadd.f32 %v47_v51, %v34_v49  ;;  %v53_v54 = vadd.f32 %v49_v52, %v35_v50  ;;  %v241_v49 = vld [vmem:[%s460_s2] sm:$0xff]  ;;  %s323_s2 = scalar_lea.vmem %s272_s12, 256 }
  0xf8   :  { %v245_v52 = vld [vmem:[%s461_s3] sm:$0xff]  ;;  %p324_p0 = scmp.ne.s32.totalorder %s272_s12, %s323_s2  ;;  %p329_p2 = scmp.lt.s32.totalorder %s323_s2, %s323_s2 }
  0xfa   :  { %p330_p3 = por %p329_p2, %p328_p1 }
  0xfb   :  { %v65_v55 = vpop.permute.xlu1 %64  ;;  %v63_v56 = vpop.permute.xlu0 %62 }
  0xfc   :  { %v69_v59 = vadd.f32 %v65_v55, %v53_v54  ;;  %v68_v60 = vadd.f32 %v63_v56, %v52_v53  ;;  %p331_p4 = pnand %p330_p3, %p324_p0 }
  0xfe   :  { %v87_v61 = vadd.f32 %v85_v58, %v69_v59  ;;  %v86_v62 = vadd.f32 %v84_v57, %v68_v60 }
  0xff   :  { %v99_v63 = vpop.permute.xlu1 %98  ;;  %v97_v0 = vpop.permute.xlu0 %96 }
 0x100   :  { %v102_v1 = vadd.f32 %v97_v0, %v86_v62  ;;  %v103_v6 = vadd.f32 %v99_v63, %v87_v61 }
 0x103   :  { %v113_v2 = vpop.permute.xlu1 %112  ;;  %v147_v3 = vpop.permute.xlu0 %146 }
 0x104   :  { %v118_v5 = vadd.f32 %v113_v2, %v102_v1 }
 0x106   :  { %v136_v7 = vadd.f32 %v134_v4, %v118_v5 }
 0x107   :  { %v115_v8 = vpop.permute.xlu1 %114  ;;  %v163_v9 = vpop.permute.xlu0 %162 }
 0x108   :  { %v152_v11 = vadd.f32 %v147_v3, %v136_v7  ;;  %v119_v12 = vadd.f32 %v115_v8, %v103_v6 }
 0x10a   :  { %v168_v14 = vadd.f32 %v163_v9, %v152_v11  ;;  %v137_v15 = vadd.f32 %v135_v10, %v119_v12 }
 0x10b   :  { %v149_v16 = vpop.permute.xlu1 %148  ;;  %v197_v17 = vpop.permute.xlu0 %196 }
 0x10c   :  { %v186_v18 = vadd.f32 %v184_v13, %v168_v14  ;;  %v153_v19 = vadd.f32 %v149_v16, %v137_v15 }
 0x10e   :  { %v202_v22 = vadd.f32 %v197_v17, %v186_v18 }
 0x10f   :  { %v165_v20 = vpop.permute.xlu1 %164  ;;  %v213_v24 = vpop.permute.xlu0 %212 }
 0x110   :  { %v169_v23 = vadd.f32 %v165_v20, %v153_v19  ;;  %v218_v27 = vadd.f32 %v213_v24, %v202_v22 }
 0x112   :  { %v187_v25 = vadd.f32 %v185_v21, %v169_v23  ;;  %v227_v30 = vmul.f32 %v218_v27, %v218_v27  ;;  %v221_v33 = vsel %vm220_vm0, %v218_v27, 0.0 }
 0x113   :  { %v199_v26 = vpop.permute.xlu1 %198 }
 0x114   :  { %v203_v28 = vadd.f32 %v199_v26, %v187_v25  ;;  %v229_v36 = vsel %vm220_vm0, %v227_v30, 0.0 }
 0x117   :  { %v215_v29 = vpop.permute.xlu1 %214 }
 0x118   :  { %v219_v31 = vadd.f32 %v215_v29, %v203_v28 }
 0x11a   :  { %v228_v32 = vmul.f32 %v219_v31, %v219_v31  ;;  %v222_v34 = vsel %vm220_vm0, %v219_v31, 0.0 }
 0x11b   :  { %v223_v35 = vadd.f32 %v222_v34, %v221_v33 }
 0x11c   :  { %v230_v37 = vsel %vm220_vm0, %v228_v32, 0.0 }
 0x11d   :  { %v224_v38 = vsel %vm220_vm0, %v223_v35, 0.0  ;;  %v231_v39 = vadd.f32 %v230_v37, %v229_v36 }
 0x11e   :  { %225 = vadd.xlane.f32.xlu0 %v224_v38 }
 0x11f   :  { %v232_v40 = vsel %vm220_vm0, %v231_v39, 0.0 }
 0x120   :  { %233 = vadd.xlane.f32.xlu1 %v232_v40 }
 0x1ab   :  { %v226_v41 = vpop.xlane.xlu0 %225 }
 0x1ac   :  { %v236_v42 = vmul.f32 0.03125, %v226_v41 }
 0x1ad   :  { %v234_v43 = vpop.xlane.xlu1 %233 }
 0x1ae   :  { %v238_v44 = vmul.f32 %v236_v42, %v236_v42  ;;  %v237_v45 = vmul.f32 0.03125, %v234_v43 }
 0x1b0   :  { %v239_v46 = vsub.f32 %v237_v45, %v238_v44 }
 0x1b2   :  { %v240_v47 = vmax.f32 %v239_v46, 0.0 }
 0x1b4   :  { %v242_v48 = vadd.f32 1e-05, %v240_v47 }
 0x1b6   :  { %321 = vrsqrt.f32 %v242_v48 }
 0x1c0   :  { %v322_v50 = vpop.eup %321 }
 0x1c1   :  { %v244_v51 = vmul.f32 %v322_v50, %v241_v49 }
 0x1c3   :  { %250 = vperm.xlu0 %319, %v244_v51   ;;  %v246_v53 = vmul.f32 %v244_v51, %v236_v42 }
 0x1c5   :  { %v247_v54 = vsub.f32 %v245_v52, %v246_v53 }
 0x1c7   :  { %257 = vperm.xlu1 %320, %v247_v54  }
 0x242   :  { %v251_v55 = vpop.permute.xlu0 %250 }
 0x243   :  { %v253_v56 = vmul.f32 %v251_v55, %v218_v27  ;;  %v254_v57 = vmul.f32 %v251_v55, %v219_v31 }
 0x246   :  { %v258_v58 = vpop.permute.xlu1 %257 }
 0x247   :  { %v260_v59 = vadd.f32 %v258_v58, %v253_v56  ;;  %v261_v60 = vadd.f32 %v258_v58, %v254_v57 }
 0x249   :  { %v262_v61 = vmax.f32 %v260_v59, 0.0  ;;  %v263_v62 = vmax.f32 %v261_v60, 0.0 }
 0x24b   :  { %264 = vst.msk [vmem:[#allocation2] sm:$0xff] %vm220_vm0, %v262_v61  ;;  %265 = vst.msk [vmem:[#allocation2 + $0x8] sm:$0xff] %vm220_vm0, %v263_v62 }
 0x24c   :  { %334 = shalt.err (!%p331_p4)
}
 0x24d   :  { %s335_s14 = scalar_lea.hbm %s462_s4, 256 }
 0x24e   :  { %p336_p5 = scmp.ne.s32.totalorder %s462_s4, %s335_s14  ;;  %p339_p6 = scmp.lt.u32.totalorder %s335_s14, %s462_s4 }
 0x250   :  { %p341_p7 = pnand %p339_p6, %p336_p5 }
 0x252   :  { %344 = shalt.err (!%p341_p7)
}
 0x253   :  { %s362_s18 = smov 128   ;;  %s363_s19 = smov 8  }
 0x254   :  { %277 = dma.vmem_to_hbm [thread:$0]  %s272_s12, 256, %s462_s4, [#allocation3], %s362_s18, %s362_s18, %s363_s19  }
 0x255   :  { %345 = dma.done.wait [#allocation3], 256  }
 0x256   :  { %346 = vsyncadd [#allocation3], 4294967040 }
 0x257   :  { %281 = vsyncpa [#allocation3], 1 }

</bundles_post_ra>
